<compile_context>
chip_gen: v6e
topology: v6e:2x2x1
jax: 0.10.0
libtpu: 0.0.40
codegen_flags: <defaults>
</compile_context>

<pallas_src>
import jax
import jax.numpy as jnp
from jax import lax
from jax.experimental import pallas as pl
from jax.experimental.pallas import tpu as pltpu


_SWEET_SPOT_BYTES = 2 << 20   # per-stream input block target (1-2 MiB sweet spot)
_MIN_GRID_STEPS = 4           # keep both v7x TensorCores busy + enable overlap


# ----------------------------------------------------------------------------
# Kernel body — shared by the 3-D "(heads, seq, dim)" path and the lane-dense
# 2-D "(heads, seq*dim)" decode path.
# ----------------------------------------------------------------------------
def _rotary_fused_kernel(q_ref, k_ref, cos_ref, sin_ref, oq_ref, ok_ref):
    # cos_ref: interleaved [c0,c0,c1,c1,...]; sin_ref: sign-folded [-s0,+s0,...]
    cos = cos_ref[...]
    sin = sin_ref[...]
    if cos.ndim < q_ref.ndim:        # 3-D path: (Ts, D) -> (1, Ts, D)
        cos = cos[None]
        sin = sin[None]

    last = q_ref.ndim - 1
    D = q_ref.shape[last]

    # Lane-parity mask, built ONCE per invocation (hoisted) and reused for q & k.
    mask_shape = (1,) * last + (D,)
    even = (lax.broadcasted_iota(jnp.int32, mask_shape, last) % 2) == 0

    def rotate(x):
        # x_up[..., 2i+1] = x[..., 2i]; x_dn[..., 2i] = x[..., 2i+1]
        # (shift = D-1 is the circular equivalent of -1; wrap-around lanes are
        #  masked out by the parity select, so the math is exact.)
        x_up = pltpu.roll(x, shift=1, axis=last)
        x_dn = pltpu.roll(x, shift=D - 1, axis=last)
        rotated = jnp.where(even, x_dn, x_up)
        # out[2i]   = x[2i]*c_i   - x[2i+1]*s_i
        # out[2i+1] = x[2i+1]*c_i + x[2i]  *s_i   (sign lives in the sin table)
        return x * cos + rotated * sin

    oq_ref[...] = rotate(q_ref[...].astype(jnp.float32)).astype(oq_ref.dtype)
    ok_ref[...] = rotate(k_ref[...].astype(jnp.float32)).astype(ok_ref.dtype)


# ----------------------------------------------------------------------------
# Tiling plans (generation-aware, table bytes included in the VMEM accounting)
# ----------------------------------------------------------------------------
def _vmem_capacity_bytes():
    try:
        return int(pltpu.get_tpu_info().vmem_capacity_bytes)
    except Exception:
        return 64 << 20            # conservative fallback (v7x physical VMEM)


def _legal_rows(t, n, mult=8):
    """Round a second-to-last block dim up to a legal value (mult of 8, or full)."""
    if n <= mult or t >= n:
        return n
    t = ((t + mult - 1) // mult) * mult
    return n if t >= n else t


def _plan_3d(nq, nk, S, D, in_item, out_item):
    vmem_cap = _vmem_capacity_bytes()
    budget_total = min(vmem_cap // 2, 48 << 20)   # total double-buffered footprint
    row_mult = max(8, 32 // max(1, in_item))      # sublane packing for the seq axis

    # Seq tile: whole S if the (S, D) slab is within the sweet spot, else tile S.
    if S * D * in_item <= _SWEET_SPOT_BYTES:
        Ts = S
    else:
        Ts = (_SWEET_SPOT_BYTES // (D * in_item)) // row_mult * row_mult
        Ts = min(max(row_mult, Ts), S)
    G_seq = pl.cdiv(S, Ts)

    # Head tile: as many heads per step as fit the per-stream sweet spot.
    Tq = max(1, min(nq, _SWEET_SPOT_BYTES // max(1, Ts * D * in_item)))
    G_heads = pl.cdiv(nq, Tq)

    # Guarantee enough grid steps for v7x's 2 TensorCores / pipelining.
    if G_seq * G_heads < _MIN_GRID_STEPS:
        G_heads = min(nq, max(G_heads, pl.cdiv(_MIN_GRID_STEPS, G_seq)))

    def footprint(tq, tk, ts):
        blocks = (tq + tk) * ts * D * (in_item + out_item) + 2 * ts * D * 4
        return 2 * blocks                          # double-buffered

    while True:
        Tq = pl.cdiv(nq, G_heads)
        Tk = pl.cdiv(nk, G_heads)
        if footprint(Tq, Tk, Ts) <= budget_total or G_heads >= nq:
            break
        G_heads = min(nq, G_heads * 2)

    fp = footprint(Tq, Tk, Ts)
    vmem_limit = int(max(fp + (2 << 20),
                         min(vmem_cap - (4 << 20), max(32 << 20, fp + (8 << 20)))))
    return G_seq, Ts, G_heads, Tq, Tk, vmem_limit


def _plan_2d(nq, nk, L, in_item, out_item):
    vmem_cap = _vmem_capacity_bytes()
    budget_total = min(vmem_cap // 2, 48 << 20)
    row_mult = max(8, 32 // max(1, in_item))

    Tq = _legal_rows(max(1, _SWEET_SPOT_BYTES // (L * in_item)), nq, row_mult)
    G = pl.cdiv(nq, Tq)
    if G < _MIN_GRID_STEPS:
        max_g = pl.cdiv(nq, row_mult) if nq >= row_mult else 1
        G = max(G, min(_MIN_GRID_STEPS, max_g))
    Tq = _legal_rows(pl.cdiv(nq, G), nq, row_mult)
    Tk = _legal_rows(pl.cdiv(nk, G), nk, row_mult)

    def footprint(tq, tk):
        return 2 * ((tq + tk) * L * (in_item + out_item) + 2 * L * 4)

    while footprint(Tq, Tk) > budget_total and G < nq:
        G = min(nq, G * 2)
        Tq = _legal_rows(pl.cdiv(nq, G), nq, row_mult)
        Tk = _legal_rows(pl.cdiv(nk, G), nk, row_mult)

    fp = footprint(Tq, Tk)
    vmem_limit = int(max(fp + (2 << 20),
                         min(vmem_cap - (4 << 20), max(32 << 20, fp + (8 << 20)))))
    return G, Tq, Tk, vmem_limit


# ----------------------------------------------------------------------------
# pallas_call wrappers
# ----------------------------------------------------------------------------
def _head_map_3d(grid_heads, n_blocks):
    if n_blocks >= grid_heads:
        return lambda j, i: (i, j, 0)
    return lambda j, i: (jnp.minimum(i, n_blocks - 1), j, 0)


def _head_map_2d(grid_heads, n_blocks):
    if n_blocks >= grid_heads:
        return lambda i: (i, 0)
    return lambda i: (jnp.minimum(i, n_blocks - 1), 0)


def _apply_rotary_3d(xq2, xk2, cos_full, sin_signed):
    nq, S, D = xq2.shape
    nk = xk2.shape[0]
    item = xq2.dtype.itemsize
    G_seq, Ts, G_heads, Tq, Tk, vmem_limit = _plan_3d(nq, nk, S, D, item, item)
    q_map = _head_map_3d(G_heads, pl.cdiv(nq, Tq))
    k_map = _head_map_3d(G_heads, pl.cdiv(nk, Tk))
    tab_map = lambda j, i: (j, 0)   # constant over inner head axis -> DMA'd once

    return pl.pallas_call(
        _rotary_fused_kernel,
        out_shape=(jax.ShapeDtypeStruct((nq, S, D), xq2.dtype),
                   jax.ShapeDtypeStruct((nk, S, D), xk2.dtype)),
        grid_spec=pltpu.PrefetchScalarGridSpec(
            num_scalar_prefetch=0,
            grid=(G_seq, G_heads),             # heads innermost
            in_specs=[
                pl.BlockSpec((Tq, Ts, D), q_map),
                pl.BlockSpec((Tk, Ts, D), k_map),
                pl.BlockSpec((Ts, D), tab_map),
                pl.BlockSpec((Ts, D), tab_map),
            ],
            out_specs=[
                pl.BlockSpec((Tq, Ts, D), q_map),
                pl.BlockSpec((Tk, Ts, D), k_map),
            ],
        ),
        compiler_params=pltpu.CompilerParams(
            dimension_semantics=("parallel", "parallel"),
            vmem_limit_bytes=vmem_limit,
        ),
    )(xq2, xk2, cos_full, sin_signed)


def _apply_rotary_2d(xq2, xk2, cos_flat, sin_flat):
    nq, L = xq2.shape
    nk = xk2.shape[0]
    item = xq2.dtype.itemsize
    G, Tq, Tk, vmem_limit = _plan_2d(nq, nk, L, item, item)
    q_map = _head_map_2d(G, pl.cdiv(nq, Tq))
    k_map = _head_map_2d(G, pl.cdiv(nk, Tk))
    tab_map = lambda i: (0, 0)

    return pl.pallas_call(
        _rotary_fused_kernel,
        out_shape=(jax.ShapeDtypeStruct((nq, L), xq2.dtype),
                   jax.ShapeDtypeStruct((nk, L), xk2.dtype)),
        grid_spec=pltpu.PrefetchScalarGridSpec(
            num_scalar_prefetch=0,
            grid=(G,),
            in_specs=[
                pl.BlockSpec((Tq, L), q_map),
                pl.BlockSpec((Tk, L), k_map),
                pl.BlockSpec((1, L), tab_map),
                pl.BlockSpec((1, L), tab_map),
            ],
            out_specs=[
                pl.BlockSpec((Tq, L), q_map),
                pl.BlockSpec((Tk, L), k_map),
            ],
        ),
        compiler_params=pltpu.CompilerParams(
            dimension_semantics=("parallel",),
            vmem_limit_bytes=vmem_limit,
        ),
    )(xq2, xk2, cos_flat, sin_flat)


def apply_rotary_fused(xq, xk, cos, sin):
    """xq: (B, Hq, S, D); xk: (B, Hk, S, D); cos/sin: (S, D//2) tables."""
    B, Hq, S, D = xq.shape
    _, Hk, _, _ = xk.shape
    assert D % 2 == 0, "head_dim must be even for rotary embedding"

    cos32 = cos.astype(jnp.float32)
    sin32 = sin.astype(jnp.float32)
    # Interleave-expand (S, D//2) -> (S, D): cos -> [c0,c0,c1,c1,...],
    # sin sign-folded -> [-s0,+s0,-s1,+s1,...]
    cos_full = jnp.repeat(cos32, 2, axis=-1)
    sin_signed = jnp.stack([-sin32, sin32], axis=-1).reshape(S, D)

    nq, nk = B * Hq, B * Hk
    item = xq.dtype.itemsize

    # Lane-dense layout for decode / short-seq / narrow-head shapes.
    use_2d = (S < 8 or D % 128 != 0) and (S * D * max(item, 4) <= (1 << 20))
    if use_2d:
        yq, yk = _apply_rotary_2d(
            xq.reshape(nq, S * D), xk.reshape(nk, S * D),
            cos_full.reshape(1, S * D), sin_signed.reshape(1, S * D))
    else:
        yq, yk = _apply_rotary_3d(
            xq.reshape(nq, S, D), xk.reshape(nk, S, D), cos_full, sin_signed)

    return yq.reshape(B, Hq, S, D), yk.reshape(B, Hk, S, D)


# ----------------------------------------------------------------------------
# Module mirror, reference, table precompute
# ----------------------------------------------------------------------------
def precompute_freqs(head_dim, seqlen, theta=10000.0):
    """Matches llama precompute_freqs_cis; returns (cos, sin) of shape (S, D//2)."""
    inv = 1.0 / (theta ** (jnp.arange(0, head_dim, 2, dtype=jnp.float32) / head_dim))
    t = jnp.arange(seqlen, dtype=jnp.float32)
    freqs = jnp.outer(t, inv)
    return jnp.cos(freqs), jnp.sin(freqs)


def ref_rotary(x, cos, sin):
    """Pure-JAX reference of apply_rotary_emb on (B, H, S, D) with (S, D//2) tables."""
    B, H, S, D = x.shape
    xr = x.reshape(B, H, S, D // 2, 2)
    x0, x1 = xr[..., 0], xr[..., 1]
    c = cos[None, None, :, :]
    s = sin[None, None, :, :]
    o0 = x0 * c - x1 * s
    o1 = x0 * s + x1 * c
    return jnp.stack([o0, o1], axis=-1).reshape(B, H, S, D)


class LlamaRotaryPallas:
    """Mirror of PytorchLlamaRotaryModel: forward(xq, xk, cos, sin) -> (xq, xk).

    freqs_cis (complex) is supplied as its real/imag parts cos, sin of shape
    (S, head_dim//2). No host-side table caching: tables are built under jit
    (tiny) and XLA caches the compiled graph per input shape.
    """

    def __init__(self, n_heads, n_kv_heads, head_dim):
        assert head_dim % 2 == 0
        self.n_heads = n_heads
        self.n_kv_heads = n_kv_heads
        self.head_dim = head_dim
        self._fn = jax.jit(apply_rotary_fused)

    def forward(self, xq, xk, cos, sin):
        return self._fn(xq, xk, cos, sin)


if __name__ == "__main__":
    def check(name, B, Hq, Hk, S, D, dtype, tol):
        key = jax.random.PRNGKey(0)
        kq, kk = jax.random.split(key)
        xq = jax.random.normal(kq, (B, Hq, S, D), dtype=jnp.float32).astype(dtype)
        xk = jax.random.normal(kk, (B, Hk, S, D), dtype=jnp.float32).astype(dtype)
        cos, sin = precompute_freqs(D, S)

        model = LlamaRotaryPallas(Hq, Hk, D)
        yq, yk = model.forward(xq, xk, cos, sin)
        jax.block_until_ready((yq, yk))

        rq = ref_rotary(xq.astype(jnp.float32), cos, sin)
        rk = ref_rotary(xk.astype(jnp.float32), cos, sin)
        assert yq.dtype == dtype and yk.dtype == dtype, f"{name}: dtype not preserved"
        assert jnp.allclose(yq.astype(jnp.float32), rq, atol=tol, rtol=tol), f"{name}: xq mismatch"
        assert jnp.allclose(yk.astype(jnp.float32), rk, atol=tol, rtol=tol), f"{name}: xk mismatch"

    # prefill-style: exercises the (heads, seq, dim) path with a multi-step grid
    check("prefill_f32", 2, 4, 2, 8, 128, jnp.float32, 1e-5)
    # decode-style (S=1): exercises the lane-dense (heads, seq*dim) path
    check("decode_f32", 2, 4, 2, 1, 128, jnp.float32, 1e-5)
    # bf16 I/O (halves HBM traffic; kernel is dtype-preserving, f32 internal math)
    check("prefill_bf16", 2, 4, 2, 8, 128, jnp.bfloat16, 2e-2)

    print("KERNEL_OK")
</pallas_src>

<mosaic_0001>
module attributes {stable_mosaic.version = 11 : i64} {
  func.func @_rotary_fused_kernel(%arg0: i32, %arg1: i32, %arg2: memref<2x8x128xf32, #tpu.memory_space<vmem>>, %arg3: memref<1x8x128xf32, #tpu.memory_space<vmem>>, %arg4: memref<8x128xf32, #tpu.memory_space<vmem>>, %arg5: memref<8x128xf32, #tpu.memory_space<vmem>>, %arg6: memref<2x8x128xf32, #tpu.memory_space<vmem>>, %arg7: memref<1x8x128xf32, #tpu.memory_space<vmem>>) attributes {dimension_semantics = [#tpu.dimension_semantics<parallel>, #tpu.dimension_semantics<parallel>], iteration_bounds = array<i64: 1, 4>, scalar_prefetch = 0 : i64, scratch_operands = 0 : i64, tpu.core_type = #tpu.core_type<tc>, window_params = [{transform_indices = @transform_0, window_bounds = array<i64: 2, 8, 128>}, {transform_indices = @transform_1, window_bounds = array<i64: 1, 8, 128>}, {transform_indices = @transform_2, window_bounds = array<i64: 8, 128>}, {transform_indices = @transform_3, window_bounds = array<i64: 8, 128>}, {transform_indices = @transform_4, window_bounds = array<i64: 2, 8, 128>}, {transform_indices = @transform_5, window_bounds = array<i64: 1, 8, 128>}]} {
    %c0 = arith.constant 0 : index
    %c0_0 = arith.constant 0 : index
    %0 = vector.load %arg4[%c0, %c0_0] : memref<8x128xf32, #tpu.memory_space<vmem>>, vector<8x128xf32>
    %c0_1 = arith.constant 0 : index
    %c0_2 = arith.constant 0 : index
    %1 = vector.load %arg5[%c0_1, %c0_2] : memref<8x128xf32, #tpu.memory_space<vmem>>, vector<8x128xf32>
    %2 = vector.shape_cast %0 : vector<8x128xf32> to vector<1x8x128xf32>
    %3 = vector.shape_cast %1 : vector<8x128xf32> to vector<1x8x128xf32>
    %4 = tpu.iota {dimensions = array<i32: 2>} : vector<1x1x128xi32>
    %c2_i32 = arith.constant 2 : i32
    %c0_i32 = arith.constant 0 : i32
    %5 = arith.cmpi eq, %c2_i32, %c0_i32 : i32
    %c1_i32 = arith.constant 1 : i32
    %6 = arith.select %5, %c1_i32, %c2_i32 : i32
    %7 = vector.broadcast %6 : i32 to vector<1x1x128xi32>
    %8 = arith.remsi %4, %7 : vector<1x1x128xi32>
    %c0_i32_3 = arith.constant 0 : i32
    %9 = vector.broadcast %c0_i32_3 : i32 to vector<1x1x128xi32>
    %10 = arith.cmpi ne, %8, %9 : vector<1x1x128xi32>
    %c0_i32_4 = arith.constant 0 : i32
    %11 = vector.broadcast %c0_i32_4 : i32 to vector<1x1x128xi32>
    %12 = arith.cmpi slt, %8, %11 : vector<1x1x128xi32>
    %c0_i32_5 = arith.constant 0 : i32
    %13 = arith.cmpi slt, %6, %c0_i32_5 : i32
    %14 = vector.broadcast %13 : i1 to vector<1x1x128xi1>
    %15 = vector.broadcast %14 : vector<1x1x128xi1> to vector<1x1x128xi1>
    %16 = arith.xori %12, %15 : vector<1x1x128xi1>
    %17 = arith.andi %16, %10 : vector<1x1x128xi1>
    %18 = vector.broadcast %6 : i32 to vector<1x1x128xi32>
    %19 = arith.addi %8, %18 : vector<1x1x128xi32>
    %20 = arith.select %17, %19, %8 : vector<1x1x128xi1>, vector<1x1x128xi32>
    %c0_i32_6 = arith.constant 0 : i32
    %21 = vector.broadcast %c0_i32_6 : i32 to vector<1x1x128xi32>
    %22 = arith.cmpi eq, %20, %21 : vector<1x1x128xi32>
    %c0_7 = arith.constant 0 : index
    %c0_8 = arith.constant 0 : index
    %c0_9 = arith.constant 0 : index
    %23 = vector.load %arg2[%c0_7, %c0_8, %c0_9] : memref<2x8x128xf32, #tpu.memory_space<vmem>>, vector<2x8x128xf32>
    %c1_i32_10 = arith.constant 1 : i32
    %24 = tpu.dynamic_rotate %23 by %c1_i32_10 dim 2 : vector<2x8x128xf32>, i32 -> vector<2x8x128xf32>
    %c127_i32 = arith.constant 127 : i32
    %25 = tpu.dynamic_rotate %23 by %c127_i32 dim 2 : vector<2x8x128xf32>, i32 -> vector<2x8x128xf32>
    %26 = vector.shape_cast %22 : vector<1x1x128xi1> to vector<1x1x128xi1>
    %27 = vector.broadcast %26 : vector<1x1x128xi1> to vector<2x8x128xi1>
    %28 = arith.select %27, %25, %24 : vector<2x8x128xi1>, vector<2x8x128xf32>
    %29 = vector.broadcast %2 : vector<1x8x128xf32> to vector<2x8x128xf32>
    %30 = arith.mulf %23, %29 : vector<2x8x128xf32>
    %31 = vector.broadcast %3 : vector<1x8x128xf32> to vector<2x8x128xf32>
    %32 = arith.mulf %28, %31 : vector<2x8x128xf32>
    %33 = arith.addf %30, %32 : vector<2x8x128xf32>
    %c0_11 = arith.constant 0 : index
    %c0_12 = arith.constant 0 : index
    %c0_13 = arith.constant 0 : index
    %34 = vector.load %arg6[%c0_11, %c0_12, %c0_13] : memref<2x8x128xf32, #tpu.memory_space<vmem>>, vector<2x8x128xf32>
    tpu.vector_store %arg6[%c0_11, %c0_12, %c0_13], %33 {strides = array<i32>} : memref<2x8x128xf32, #tpu.memory_space<vmem>>, vector<2x8x128xf32>,
    %c0_14 = arith.constant 0 : index
    %c0_15 = arith.constant 0 : index
    %c0_16 = arith.constant 0 : index
    %35 = vector.load %arg3[%c0_14, %c0_15, %c0_16] : memref<1x8x128xf32, #tpu.memory_space<vmem>>, vector<1x8x128xf32>
    %c1_i32_17 = arith.constant 1 : i32
    %36 = tpu.dynamic_rotate %35 by %c1_i32_17 dim 2 : vector<1x8x128xf32>, i32 -> vector<1x8x128xf32>
    %c127_i32_18 = arith.constant 127 : i32
    %37 = tpu.dynamic_rotate %35 by %c127_i32_18 dim 2 : vector<1x8x128xf32>, i32 -> vector<1x8x128xf32>
    %38 = vector.shape_cast %22 : vector<1x1x128xi1> to vector<1x1x128xi1>
    %39 = vector.broadcast %38 : vector<1x1x128xi1> to vector<1x8x128xi1>
    %40 = arith.select %39, %37, %36 : vector<1x8x128xi1>, vector<1x8x128xf32>
    %41 = arith.mulf %35, %2 : vector<1x8x128xf32>
    %42 = arith.mulf %40, %3 : vector<1x8x128xf32>
    %43 = arith.addf %41, %42 : vector<1x8x128xf32>
    %c0_19 = arith.constant 0 : index
    %c0_20 = arith.constant 0 : index
    %c0_21 = arith.constant 0 : index
    %44 = vector.load %arg7[%c0_19, %c0_20, %c0_21] : memref<1x8x128xf32, #tpu.memory_space<vmem>>, vector<1x8x128xf32>
    tpu.vector_store %arg7[%c0_19, %c0_20, %c0_21], %43 {strides = array<i32>} : memref<1x8x128xf32, #tpu.memory_space<vmem>>, vector<1x8x128xf32>,
    return
  }
  func.func @transform_0(%arg0: i32, %arg1: i32) -> (i32, i32, i32) {
    %c0_i32 = arith.constant 0 : i32
    %c0_i32_0 = arith.constant 0 : i32
    return %arg1, %arg0, %c0_i32 : i32, i32, i32
  }
  func.func @transform_1(%arg0: i32, %arg1: i32) -> (i32, i32, i32) {
    %c0_i32 = arith.constant 0 : i32
    %c0_i32_0 = arith.constant 0 : i32
    return %arg1, %arg0, %c0_i32 : i32, i32, i32
  }
  func.func @transform_2(%arg0: i32, %arg1: i32) -> (i32, i32) {
    %c0_i32 = arith.constant 0 : i32
    %c0_i32_0 = arith.constant 0 : i32
    return %arg0, %c0_i32 : i32, i32
  }
  func.func @transform_3(%arg0: i32, %arg1: i32) -> (i32, i32) {
    %c0_i32 = arith.constant 0 : i32
    %c0_i32_0 = arith.constant 0 : i32
    return %arg0, %c0_i32 : i32, i32
  }
  func.func @transform_4(%arg0: i32, %arg1: i32) -> (i32, i32, i32) {
    %c0_i32 = arith.constant 0 : i32
    %c0_i32_0 = arith.constant 0 : i32
    return %arg1, %arg0, %c0_i32 : i32, i32, i32
  }
  func.func @transform_5(%arg0: i32, %arg1: i32) -> (i32, i32, i32) {
    %c0_i32 = arith.constant 0 : i32
    %c0_i32_0 = arith.constant 0 : i32
    return %arg1, %arg0, %c0_i32 : i32, i32, i32
  }
}

</mosaic_0001>

<bundles_post_ra>
// kernel: apply_rotary_fused.1
= control target key start
LH: loop header
LB: loop body
LE: loop exit
PB: predicated region body
PF: predicated region fallthrough
CT: control target
= control target key end

     0   :  { %s953_s0 = inlined_call_operand.vmem [shape: f32[8,8,128], index: 0, kind: input, shape index: {}]   ;;  %s954_s1 = inlined_call_operand.vmem [shape: f32[4,8,128], index: 1, kind: input, shape index: {}]   ;;  %s955_s2 = inlined_call_operand.vmem [shape: f32[8,128], index: 2, kind: input, shape index: {}]   ;;  %s956_s3 = inlined_call_operand.vmem [shape: f32[8,128], index: 3, kind: input, shape index: {}]   ;;  %s957_s4 = inlined_call_operand.hbm [shape: f32[8,8,128], index: 4, kind: output, shape index: {0}]   ;;  %s958_s5 = inlined_call_operand.hbm [shape: f32[4,8,128], index: 5, kind: output, shape index: {1}]  }
   0x1   :  { %959 = sst [smem:[#allocation8_spill]] %s953_s0 }
   0x2   :  { %960 = sst [smem:[#allocation9_spill]] %s954_s1 }
   0x3   :  { %11 = vsyncpa [#allocation3], 0 }
   0x4   :  { %13 = vsyncpa [#allocation3 + $0x1], 0 }
   0x5   :  { %14 = vsyncpa [#allocation5], 0 }
   0x6   :  { %16 = vsyncpa [#allocation5 + $0x1], 0  ;;  %s790_s18 = smov 0   ;;  %s792_s19 = smov 0  }
   0x7   :  { %s794_s20 = smov 0   ;;  %s796_s21 = smov 0  }
   0x8   :  { %s798_s22 = smov 0   ;;  %s800_s23 = smov 0  }
   0x9 LB: > { %s562_s24 = sadd.s32 4294967295, %s752_s23   ;;  %s563_s25 = sadd.s32 4294967294, %s752_s23   ;;  %s752_s23 = sphi %s800_s23, %s22_s23   ;;  %s748_s22 = sphi %s798_s22, %s972_s22   ;;  %s744_s21 = sphi %s796_s21, %s971_s21   ;;  %s740_s20 = sphi %s794_s20, %s970_s20   ;;  %s736_s19 = sphi %s792_s19, %s969_s19   ;;  %s732_s18 = sphi %s790_s18, %s968_s18  }
   0xa   : > { %s31_s26 = sadd.s32 1, %s748_s22  ;;  %s151_s27 = sadd.s32 1, %s740_s20 }
   0xb   : > { %p32_p0 = scmp.ge.s32.totalorder %s31_s26, 4  ;;  %p161_p1 = scmp.ne.s32.totalorder %s740_s20, %s736_s19 }
   0xc   : > { %p162_p2 = scmp.eq.s32.totalorder %s562_s24, 3  ;;  %p167_p3 = scmp.ne.s32.totalorder %s736_s19, %s732_s18 }
   0xd   : > { %s974_s26 = smov (%p32_p0, %s31_s26), 0  ;;  %p168_p5 = scmp.eq.s32.totalorder %s563_s25, 3 }
   0xe   : > { %p830_p4 = por %p162_p2, %p161_p1  ;;  %s146_s29 = ssub.s32 %s748_s22, %s974_s26 }
   0xf   : > { %p568_p6 = scmp.ge.s32.totalorder %s752_s23, 1  ;;  %p149_p7 = scmp.eq.s32.totalorder %s146_s29, 0 }
  0x10   : > { %p837_p8 = por %p168_p5, %p167_p3  ;;  %p250_p9 = scmp.lt.s32.totalorder %s752_s23, 5 }
  0x11   : > { %s843_s6 = scalar_select %p149_p7, %s740_s20, %s151_s27  }
  0x12   : > { %p251_p10 = pnand %p568_p6, %p250_p9 }
  0x13   : > { %s571_s7 = sshll.u32 (!%p251_p10), %s744_s21, 1  ;;  %p310_p12 = scmp.lt.s32.totalorder (!%p251_p10), %s744_s21, 3 }
  0x14   : > { %254 = sbr.rel (%p251_p10) target bundleno = 191 (0xbf), region = 36  ;;  %p302_p11 = scmp.lt.s32.totalorder (!%p251_p10), %s571_s7, 7 }
  0x15   : > { %s963_s0 = sld [smem:[#allocation8_spill]] (!%p251_p10)  ;;  %s754_s14 = smov (!%p251_p10), 127  }
  0x16   : > { %s755_s15 = smov (!%p251_p10), 1   ;;  %s964_s1 = sld [smem:[#allocation9_spill]] (!%p251_p10) }
  0x17   : > { %s858_s29 = sand.u32 (!%p251_p10), 1, %s736_s19   ;;  %s578_s17 = sshll.u32 (!%p251_p10), %s744_s21, 7 }
  0x18   : > { %s570_s10 = sshll.u32 (!%p251_p10), %s858_s29, 3  ;;  %s376_s27 = scalar_lea.sflag (!%p251_p10), [#allocation3], %s858_s29 }
  0x19   : > { %s976_s7 = smov (!%p302_p11, %s571_s7), 7  ;;  %v328_v3 = vlaneseq  ;;  %v326_v6 = vld [vmem:[%s955_s2] sm:$0xff] }
  0x1a   : > { %s311_s8 = scalar_select %p310_p12, %s744_s21, 3  ;;  %v327_v8 = vld [vmem:[%s956_s3] sm:$0xff] }
  0x1b   : > { %s572_s9 = sshll.u32 %s976_s7, 3  ;;  %v329_v4 = vand.u32 127, %v328_v3 }
  0x1c   : > { %s308_s12 = scalar_lea.vmem %s963_s0, %s572_s9  ;;  %s573_s13 = sshll.u32 %s311_s8, 3 }
  0x1d   : > { %v343_v0 = vld [vmem:[%s308_s12] sm:$0xff]  ;;  %v344_v1 = vld [vmem:[%s308_s12 + $0x8] sm:$0xff]  ;;  %s316_s24 = scalar_lea.vmem %s964_s1, %s573_s13  ;;  %v334_v5 = vand.u32 1, %v329_v4  ;;  %s569_s9 = sshll.u32 %s858_s29, 4 }
  0x1e   : > { %349 = vrot.lane.b32.xlu1 %v343_v0, %s754_s14  ;;  %345 = vrot.lane.b32.xlu0 %v343_v0, %s755_s15  ;;  %v365_v2 = vld [vmem:[%s316_s24] sm:$0xff]  ;;  %v357_v9 = vmul.f32 %v343_v0, %v326_v6  ;;  %v358_v14 = vmul.f32 %v344_v1, %v326_v6  ;;  %s293_s11 = scalar_lea.vmem [#allocation2], %s569_s9  ;;  %s581_s13 = sshll.u32 %s744_s21, 8 }
  0x1f   : > { %vm860_vm0 = vcmp.eq.s32.totalorder %v334_v5, 0  ;;  %s395_s12 = sshll.u32 %s293_s11, 4  ;;  %s879_s16 = scalar_lea.hbm %s957_s4, %s581_s13  ;;  %v371_v20 = vmul.f32 %v365_v2, %v326_v6  ;;  %s874_s12 = int_to_ptr.vmem [resolvable:$true] %s395_s12 }
  0x20   : > { %s884_s24 = scalar_lea.vmem [#allocation4], %s570_s10  ;;  %s646_s7 = scalar_lea.vmem %s874_s12, 256 }
  0x21   : > { %p647_p13 = scmp.ne.s32.totalorder %s874_s12, %s646_s7  ;;  %s756_s8 = smov [#allocation2]  }
  0x22   : > { %351 = vrot.lane.b32.xlu1 %v344_v1, %s754_s14  ;;  %347 = vrot.lane.b32.xlu0 %v344_v1, %s755_s15  ;;  %s650_s9 = sshll.u32 %s756_s8, 4  ;;  %s651_s9 = int_to_ptr.vmem [resolvable:$false] %s650_s9 }
  0x23   : > { %p648_p0 = pnand %p647_p13, %p830_p4  ;;  %s652_s13 = scalar_lea.vmem %s651_s9, 512 }
  0x24   : > { %p653_p2 = scmp.lt.s32.totalorder %s874_s12, %s651_s9  ;;  %p654_p3 = scmp.lt.s32.totalorder %s652_s13, %s646_s7 }
  0x25   : > { %p649_p1 = pneg %p648_p0 }
  0x26   : > { %368 = vrot.lane.b32.xlu1 %v365_v2, %s754_s14  ;;  %366 = vrot.lane.b32.xlu0 %v365_v2, %s755_s15  ;;  %p655_p5 = por %p654_p3, %p653_p2 }
  0x28   : > { %p656_p6 = pnand %p655_p5, %p649_p1 }
  0x90   : > { %v350_v10 = vpop.permute.xlu1 %349  ;;  %v346_v11 = vpop.permute.xlu0 %345 }
  0x91   : > { %v355_v12 = vsel %vm860_vm0, %v350_v10, %v346_v11 }
  0x92   : > { %v359_v13 = vmul.f32 %v355_v12, %v327_v8 }
  0x94   : > { %v361_v15 = vadd.f32 %v359_v13, %v357_v9  ;;  %v352_v16 = vpop.permute.xlu1 %351  ;;  %v348_v17 = vpop.permute.xlu0 %347 }
  0x95   : > { %v356_v18 = vsel %vm860_vm0, %v352_v16, %v348_v17 }
  0x96   : > { %363 = vst [vmem:[%s293_s11] sm:$0xff] %v361_v15  ;;  %v360_v19 = vmul.f32 %v356_v18, %v327_v8 }
  0x98   : > { %v362_v21 = vadd.f32 %v360_v19, %v358_v14  ;;  %v369_v22 = vpop.permute.xlu1 %368  ;;  %v367_v23 = vpop.permute.xlu0 %366 }
  0x99   : > { %v370_v24 = vsel %vm860_vm0, %v369_v22, %v367_v23 }
  0x9a   : > { %364 = vst [vmem:[%s293_s11 + $0x8] sm:$0xff] %v362_v21  ;;  %v372_v25 = vmul.f32 %v370_v24, %v327_v8 }
  0x9b   : > { %659 = shalt.err (!%p656_p6)
}
  0x9c   : > { %s660_s10 = scalar_lea.hbm %s879_s16, 256  ;;  %s664_s15 = scalar_lea.hbm %s957_s4, 1024 }
  0x9d   : > { %p661_p7 = scmp.ne.s32.totalorder %s879_s16, %s660_s10  ;;  %p665_p11 = scmp.lt.s32.totalorder %s879_s16, %s957_s4 }
  0x9e   : > { %p666_p12 = scmp.lt.s32.totalorder %s664_s15, %s660_s10 }
  0x9f   : > { %p662_p9 = pnand %p661_p7, %p830_p4 }
  0xa0   : > { %p667_p13 = por %p666_p12, %p665_p11 }
  0xa1   : > { %p663_p10 = pneg %p662_p9 }
  0xa3   : > { %p668_p0 = pnand %p667_p13, %p663_p10 }
  0xa5   : > { %671 = shalt.err (!%p668_p0)
}
  0xa6   : > { %s757_s7 = smov 128   ;;  %s758_s9 = smov 8   ;;  %v373_v26 = vadd.f32 %v372_v25, %v371_v20 }
  0xa7   : > { %582 = dma.vmem_to_hbm [thread:$0]  (%p830_p4), %s874_s12, 256, %s879_s16, %s376_s27, %s757_s7, %s757_s7, %s758_s9  }
  0xa8   : > { %s410_s10 = scalar_lea.hbm %s958_s5, %s578_s17  ;;  %s967_s11 = sshll.u32 %s884_s24, 4  ;;  %374 = vst [vmem:[%s884_s24] sm:$0xff] %v373_v26  ;;  %s413_s11 = int_to_ptr.vmem [resolvable:$true] %s967_s11 }
  0xa9   : > { %s381_s14 = scalar_lea.sflag [#allocation5], %s858_s29  ;;  %s672_s15 = scalar_lea.vmem %s413_s11, 128 }
  0xaa   : > { %p673_p1 = scmp.ne.s32.totalorder %s413_s11, %s672_s15  ;;  %s759_s8 = smov [#allocation4]  }
  0xab   : > { %s676_s0 = sshll.u32 %s759_s8, 4  ;;  %s677_s0 = int_to_ptr.vmem [resolvable:$false] %s676_s0 }
  0xac   : > { %p674_p2 = pnand %p673_p1, %p830_p4  ;;  %s678_s1 = scalar_lea.vmem %s677_s0, 256 }
  0xad   : > { %p679_p5 = scmp.lt.s32.totalorder %s413_s11, %s677_s0  ;;  %p680_p6 = scmp.lt.s32.totalorder %s678_s1, %s672_s15 }
  0xae   : > { %p675_p3 = pneg %p674_p2 }
  0xaf   : > { %p681_p7 = por %p680_p6, %p679_p5 }
  0xb1   : > { %p682_p9 = pnand %p681_p7, %p675_p3 }
  0xb3   : > { %685 = shalt.err (!%p682_p9)
}
  0xb4   : > { %s686_s21 = scalar_lea.hbm %s410_s10, 128  ;;  %s690_s16 = scalar_lea.hbm %s958_s5, 512 }
  0xb5   : > { %p687_p10 = scmp.ne.s32.totalorder %s410_s10, %s686_s21  ;;  %p691_p13 = scmp.lt.s32.totalorder %s410_s10, %s958_s5 }
  0xb6   : > { %p692_p0 = scmp.lt.s32.totalorder %s690_s16, %s686_s21 }
  0xb7   : > { %p688_p11 = pnand %p687_p10, %p830_p4 }
  0xb8   : > { %p693_p1 = por %p692_p0, %p691_p13 }
  0xb9   : > { %p689_p12 = pneg %p688_p11 }
  0xbb   : > { %p694_p2 = pnand %p693_p1, %p689_p12 }
  0xbd   : > { %697 = shalt.err (!%p694_p2)
}
  0xbe   : > { %583 = dma.vmem_to_hbm [thread:$0]  (%p830_p4), %s413_s11, 128, %s410_s10, %s381_s14  }
  0xbf PF: > { %p593_p3 = scmp.ge.s32.totalorder %s752_s23, 2  ;;  %s424_s0 = sand.u32 1, %s732_s18  }
  0xc0   : > { %s425_s1 = scalar_lea.sflag [#allocation3], %s424_s0 }
  0xc1   : > { %p587_p5 = pnand %p593_p3, %p837_p8 }
  0xc3   : > { %p588_p6 = pneg %p587_p5 }
  0xc5   : > { %723 = dma.done.wait (%p588_p6), %s425_s1, 256  }
  0xc6   : > { %725 = vsyncadd (%p588_p6), %s425_s1, 4294967040  ;;  %s434_s27 = scalar_lea.sflag [#allocation5], %s424_s0 }
  0xc7   : > { %727 = dma.done.wait (%p588_p6), %s434_s27, 128  }
  0xc8   : > { %729 = vsyncadd (%p588_p6), %s434_s27, 4294967168  ;;  %s22_s23 = sadd.s32 1, %s752_s23   ;;  %s968_s18 = smov %s736_s19 }
  0xc9   : > { %p19_p7 = scmp.ge.s32.totalorder %s22_s23, 6   ;;  %s969_s19 = smov %s740_s20 }
  0xca   : > { %s970_s20 = smov %s843_s6  ;;  %s971_s21 = smov %s748_s22 }
  0xcb   : > { %s972_s22 = smov %s974_s26  ;;  %21 = sbr.rel (!%p19_p7) target bundleno = 9 (0x9), region = 97 }
  0xd0   :  { %439 = vsyncpa [#allocation3], 1 }
  0xd1   :  { %441 = vsyncpa [#allocation3 + $0x1], 1 }
  0xd2   :  { %442 = vsyncpa [#allocation5], 1 }
  0xd3   :  { %444 = vsyncpa [#allocation5 + $0x1], 1 }

</bundles_post_ra>
